<compile_context>
chip_gen: v6e
topology: v6e:2x2x1
jax: 0.10.0
libtpu: 0.0.40
codegen_flags: <defaults>
</compile_context>

<pallas_src>
import functools

import jax
import jax.numpy as jnp
from jax.experimental import pallas as pl
from jax.experimental.pallas import tpu as pltpu


_LANE = 128        # lane width (last dim)
_SUBLANE = 8       # f32 sublane count (second-to-last dim)
_NEG_BIG = -1e30   # "minus infinity" bias for padded softmax lanes


def _round_up(x, m):
    return ((x + m - 1) // m) * m


# ----------------------------------------------------------------------------
# Kernel: one grid step == Tt RNN timesteps.  Wx/Wh/bias/h0 are resident in
# VMEM (constant index_maps); the hidden state is carried across grid steps in
# the revisited output block `h_ref`.
# ----------------------------------------------------------------------------
def rnn_block_kernel(x_ref, h0_ref, wx_ref, wh_ref, b_ref, out_ref, h_ref,
                     *, tt, t_total):
    blk = pl.program_id(0)
    bp = h_ref.shape[0]              # padded batch (multiple of 8 sublanes)
    hp = h_ref.shape[1]              # padded hidden width (multiple of 128)
    ip = x_ref.shape[-1]             # padded input width (multiple of 128)

    @pl.when(blk == 0)
    def _():
        h_ref[...] = h0_ref[...]     # initialize the recurrent carry once

    # ---- Hoisted non-recurrent projection for the whole timestep block ----
    # One MXU-dense matmul with M = Tt*Bp; the bias is folded in here so the
    # per-step body has no bias add and no concatenate.
    x_blk = x_ref[...].reshape(tt * bp, ip)                       # (Tt*Bp, Ip)
    zx = jnp.dot(x_blk, wx_ref[...],
                 preferred_element_type=jnp.float32) + b_ref[...]  # (Tt*Bp, Hp+Op)

    h = h_ref[...]                   # (Bp, Hp) recurrent carry (VMEM resident)
    wh = wh_ref[...]                 # (Hp, Hp+Op) recurrent weight (resident)

    # Trace-time-unrolled inner loop over the Tt timesteps of this block.
    for t in range(tt):
        # Per-step recurrence: only the hidden contraction (K = Hp) remains.
        z = zx[t * bp:(t + 1) * bp, :] + jnp.dot(
            h, wh, preferred_element_type=jnp.float32)            # (Bp, Hp+Op)
        new_h = z[:, :hp]            # (Bp, Hp)
        logits = z[:, hp:]           # (Bp, Op)  padded lanes == -1e30 via bias

        # Numerically stable log-softmax along the lane axis (f32 everywhere).
        m = jnp.max(logits, axis=-1, keepdims=True)
        shifted = logits - m
        lse = jnp.log(jnp.sum(jnp.exp(shifted), axis=-1, keepdims=True))
        out_ref[t] = (shifted - lse).astype(out_ref.dtype)

        if t_total % tt != 0:
            # Time axis was padded up to a multiple of Tt: freeze the carry on
            # padded steps so the final hidden state is exact.
            valid = (blk * tt + t) < t_total
            new_h = jnp.where(valid, new_h, h)
        h = new_h

    h_ref[...] = h.astype(h_ref.dtype)          # carry to the next grid step


# ----------------------------------------------------------------------------
# One-time parameter packing (PyTorch (out,in) layout -> padded (in,out)
# blocks, pre-split into the input part Wx and the recurrent part Wh).
# ----------------------------------------------------------------------------
def pack_params(params, input_size, hidden_size, output_size):
    """Pack (w_i2h, b_i2h, w_i2o, b_i2o) into padded (in, out) blocks:
         Wx = [Wxh | Wxo]  (Ip, Hp+Op)     Wh = [Whh | Who]  (Hp, Hp+Op)
       plus a (1, Hp+Op) bias row.  Done ONCE, outside the time loop.
       For v6e/v7x at large H, cast Wx/Wh to bf16 here (keep bias/log-softmax f32)."""
    w_i2h, b_i2h, w_i2o, b_i2o = params
    I, H, O = input_size, hidden_size, output_size
    Ip = _round_up(I, _LANE)
    Hp = _round_up(H, _LANE)
    Op = _round_up(O, _LANE)

    w_x = jnp.zeros((Ip, Hp + Op), jnp.float32)
    w_x = w_x.at[:I, :H].set(w_i2h[:, :I].T)                 # Wxh
    w_x = w_x.at[:I, Hp:Hp + O].set(w_i2o[:, :I].T)          # Wxo

    w_h = jnp.zeros((Hp, Hp + Op), jnp.float32)
    w_h = w_h.at[:H, :H].set(w_i2h[:, I:].T)                 # Whh
    w_h = w_h.at[:H, Hp:Hp + O].set(w_i2o[:, I:].T)          # Who

    b = jnp.full((Hp + Op,), _NEG_BIG, jnp.float32)          # padded logits -> -inf
    b = b.at[:Hp].set(0.0)                                   # padded hidden lanes stay 0
    b = b.at[:H].set(b_i2h)
    b = b.at[Hp:Hp + O].set(b_i2o)
    b = b[None, :]                                           # (1, Hp+Op) row

    dims = (I, H, O, Ip, Hp, Op)
    return w_x, w_h, b, dims


# ----------------------------------------------------------------------------
# Fused multi-step forward: T timesteps in a single pallas_call, Tt per grid
# step.
# ----------------------------------------------------------------------------
def rnn_forward_sequence(x_seq, hidden, w_x, w_h, b, *, dims, block_t=8):
    """x_seq: (T, B, I), hidden: (B, H) -> (log_probs (T, B, O), final hidden (B, H))."""
    I, H, O, Ip, Hp, Op = dims
    T, B, _ = x_seq.shape
    Bp = _round_up(max(B, _SUBLANE), _SUBLANE)
    Tt = min(block_t, T)                  # timesteps per grid step
    Tp = _round_up(T, Tt)
    n_blocks = Tp // Tt

    # Pad to lane/sublane-dense shapes once, outside the time loop.
    x_pad = jnp.zeros((Tp, Bp, Ip), jnp.float32).at[:T, :B, :I].set(x_seq)
    h_pad = jnp.zeros((Bp, Hp), jnp.float32).at[:B, :H].set(hidden)

    kernel = functools.partial(rnn_block_kernel, tt=Tt, t_total=T)

    out_pad, h_final_pad = pl.pallas_call(
        kernel,
        out_shape=(jax.ShapeDtypeStruct((Tp, Bp, Op), jnp.float32),
                   jax.ShapeDtypeStruct((Bp, Hp), jnp.float32)),
        grid=(n_blocks,),
        in_specs=[
            pl.BlockSpec((Tt, Bp, Ip), lambda i: (i, 0, 0)),      # x block (pipelined)
            pl.BlockSpec((Bp, Hp), lambda i: (0, 0)),             # h0 (resident)
            pl.BlockSpec((Ip, Hp + Op), lambda i: (0, 0)),        # Wx (resident)
            pl.BlockSpec((Hp, Hp + Op), lambda i: (0, 0)),        # Wh (resident)
            pl.BlockSpec((1, Hp + Op), lambda i: (0, 0)),         # bias row (resident)
        ],
        out_specs=(
            pl.BlockSpec((Tt, Bp, Op), lambda i: (i, 0, 0)),      # per-step log-probs
            pl.BlockSpec((Bp, Hp), lambda i: (0, 0)),             # hidden carry / final h
        ),
        compiler_params=pltpu.CompilerParams(
            dimension_semantics=("arbitrary",),                   # time axis is sequential
            vmem_limit_bytes=32 * 1024 * 1024),
    )(x_pad, h_pad, w_x, w_h, b)

    return out_pad[:T, :B, :O], h_final_pad[:B, :H]


def rnn_forward(inp, hidden, w_x, w_h, b, *, dims):
    """Single RNN step — matches the PyTorch module's forward(inp, hidden)."""
    out_seq, new_hidden = rnn_forward_sequence(inp[None], hidden, w_x, w_h, b, dims=dims)
    return out_seq[0], new_hidden


# ----------------------------------------------------------------------------
# Init (nn.Linear-style, PyTorch (out, in) layout) and a pure-JAX reference.
# ----------------------------------------------------------------------------
def init_params(key, input_size, hidden_size, output_size):
    k1, k2, k3, k4 = jax.random.split(key, 4)
    fan_in = input_size + hidden_size
    bound = 1.0 / jnp.sqrt(jnp.float32(fan_in))
    w_i2h = jax.random.uniform(k1, (hidden_size, fan_in), jnp.float32, -bound, bound)
    b_i2h = jax.random.uniform(k2, (hidden_size,), jnp.float32, -bound, bound)
    w_i2o = jax.random.uniform(k3, (output_size, fan_in), jnp.float32, -bound, bound)
    b_i2o = jax.random.uniform(k4, (output_size,), jnp.float32, -bound, bound)
    return w_i2h, b_i2h, w_i2o, b_i2o


def _ref_step(params, x, h):
    w_i2h, b_i2h, w_i2o, b_i2o = params
    comb = jnp.concatenate([x, h], axis=1)
    hi = jax.lax.Precision.HIGHEST
    new_h = jnp.dot(comb, w_i2h.T, precision=hi) + b_i2h
    logits = jnp.dot(comb, w_i2o.T, precision=hi) + b_i2o
    return jax.nn.log_softmax(logits, axis=1), new_h


if __name__ == "__main__":
    key = jax.random.PRNGKey(0)
    k_x, k_h, k_p, k_s = jax.random.split(key, 4)

    B, input_size, hidden_size, output_size, T = 2, 16, 32, 8, 8

    params = init_params(k_p, input_size, hidden_size, output_size)
    w_x, w_h, b, dims = pack_params(params, input_size, hidden_size, output_size)

    inp = jax.random.normal(k_x, (B, input_size), jnp.float32)
    hidden = jax.random.normal(k_h, (B, hidden_size), jnp.float32)

    # --- single step (module semantics: forward(inp, hidden) -> (output, hidden)) ---
    step_fn = jax.jit(functools.partial(rnn_forward, dims=dims))
    out, new_hidden = step_fn(inp, hidden, w_x, w_h, b)
    jax.block_until_ready((out, new_hidden))

    ref_out, ref_h = _ref_step(params, inp, hidden)
    assert out.shape == (B, output_size)
    assert new_hidden.shape == (B, hidden_size)
    assert bool(jnp.all(jnp.abs(jnp.exp(out).sum(axis=1) - 1.0) < 1e-4))
    assert bool(jnp.allclose(out, ref_out, atol=5e-3, rtol=5e-3))
    assert bool(jnp.allclose(new_hidden, ref_h, atol=5e-3, rtol=5e-3))

    # --- fused sequence: T timesteps in ONE pallas_call (weights stay resident) ---
    x_seq = jax.random.normal(k_s, (T, B, input_size), jnp.float32)
    seq_fn = jax.jit(functools.partial(rnn_forward_sequence, dims=dims))
    out_seq, h_final = seq_fn(x_seq, hidden, w_x, w_h, b)
    jax.block_until_ready((out_seq, h_final))

    def ref_scan(h, x):
        o, nh = _ref_step(params, x, h)
        return nh, o

    ref_hT, ref_outs = jax.lax.scan(ref_scan, hidden, x_seq)
    assert out_seq.shape == (T, B, output_size)
    assert h_final.shape == (B, hidden_size)
    assert bool(jnp.allclose(out_seq, ref_outs, atol=5e-3, rtol=5e-3))
    assert bool(jnp.allclose(h_final, ref_hT, atol=5e-3, rtol=5e-3))

    # TODO(synk): for large H on v6e/v7x, cast Wx/Wh (and x/h) to bf16 at pack
    # time, add K-tiling over Wh rows, and add a "parallel" batch-block grid
    # axis to use v7x's second TensorCore; kept f32 / single-core here.
    print("KERNEL_OK")
</pallas_src>

<mosaic_0001>
module attributes {stable_mosaic.version = 11 : i64} {
  func.func @rnn_block_kernel(%arg0: i32, %arg1: memref<1x8x128xf32, #tpu.memory_space<vmem>>, %arg2: memref<8x128xf32, #tpu.memory_space<vmem>>, %arg3: memref<128x256xf32, #tpu.memory_space<vmem>>, %arg4: memref<128x256xf32, #tpu.memory_space<vmem>>, %arg5: memref<1x256xf32, #tpu.memory_space<vmem>>, %arg6: memref<1x8x128xf32, #tpu.memory_space<vmem>>, %arg7: memref<8x128xf32, #tpu.memory_space<vmem>>) attributes {dimension_semantics = [#tpu.dimension_semantics<arbitrary>], iteration_bounds = array<i64: 1>, scalar_prefetch = 0 : i64, scratch_operands = 0 : i64, tpu.core_type = #tpu.core_type<tc>, window_params = [{transform_indices = @transform_0, window_bounds = array<i64: 1, 8, 128>}, {pipeline_mode = #tpu.pipeline_mode<synchronous>, transform_indices = @transform_1, window_bounds = array<i64: 8, 128>}, {pipeline_mode = #tpu.pipeline_mode<synchronous>, transform_indices = @transform_2, window_bounds = array<i64: 128, 256>}, {pipeline_mode = #tpu.pipeline_mode<synchronous>, transform_indices = @transform_3, window_bounds = array<i64: 128, 256>}, {pipeline_mode = #tpu.pipeline_mode<synchronous>, transform_indices = @transform_4, window_bounds = array<i64: 1, 256>}, {transform_indices = @transform_5, window_bounds = array<i64: 1, 8, 128>}, {pipeline_mode = #tpu.pipeline_mode<synchronous>, transform_indices = @transform_6, window_bounds = array<i64: 8, 128>}]} {
    %c0_i32 = arith.constant 0 : i32
    %0 = arith.cmpi eq, %arg0, %c0_i32 : i32
    %1 = arith.extui %0 : i1 to i32
    %c0_i32_0 = arith.constant 0 : i32
    %2 = arith.cmpi ne, %1, %c0_i32_0 : i32
    scf.if %2 {
      %c0_19 = arith.constant 0 : index
      %c0_20 = arith.constant 0 : index
      %30 = vector.load %arg2[%c0_19, %c0_20] : memref<8x128xf32, #tpu.memory_space<vmem>>, vector<8x128xf32>
      %c0_21 = arith.constant 0 : index
      %c0_22 = arith.constant 0 : index
      %31 = vector.load %arg7[%c0_21, %c0_22] : memref<8x128xf32, #tpu.memory_space<vmem>>, vector<8x128xf32>
      tpu.vector_store %arg7[%c0_21, %c0_22], %30 {strides = array<i32>} : memref<8x128xf32, #tpu.memory_space<vmem>>, vector<8x128xf32>,
    } else {
    }
    %c0 = arith.constant 0 : index
    %c0_1 = arith.constant 0 : index
    %c0_2 = arith.constant 0 : index
    %3 = vector.load %arg1[%c0, %c0_1, %c0_2] : memref<1x8x128xf32, #tpu.memory_space<vmem>>, vector<1x8x128xf32>
    %4 = vector.shape_cast %3 : vector<1x8x128xf32> to vector<8x128xf32>
    %c0_3 = arith.constant 0 : index
    %c0_4 = arith.constant 0 : index
    %5 = vector.load %arg3[%c0_3, %c0_4] : memref<128x256xf32, #tpu.memory_space<vmem>>, vector<128x256xf32>
    %cst = arith.constant dense<0.000000e+00> : vector<8x256xf32>
    %6 = tpu.matmul %4, %5, %cst {dimension_numbers = #tpu.dot_dimension_numbers<[1], [0], [0], [1], [0, 0, 1, 1], [], []>} : vector<8x128xf32>, vector<128x256xf32>, vector<8x256xf32> -> vector<8x256xf32>
    %c0_5 = arith.constant 0 : index
    %c0_6 = arith.constant 0 : index
    %7 = vector.load %arg5[%c0_5, %c0_6] : memref<1x256xf32, #tpu.memory_space<vmem>>, vector<1x256xf32>
    %8 = vector.broadcast %7 : vector<1x256xf32> to vector<8x256xf32>
    %9 = arith.addf %6, %8 : vector<8x256xf32>
    %c0_7 = arith.constant 0 : index
    %c0_8 = arith.constant 0 : index
    %10 = vector.load %arg7[%c0_7, %c0_8] : memref<8x128xf32, #tpu.memory_space<vmem>>, vector<8x128xf32>
    %c0_9 = arith.constant 0 : index
    %c0_10 = arith.constant 0 : index
    %11 = vector.load %arg4[%c0_9, %c0_10] : memref<128x256xf32, #tpu.memory_space<vmem>>, vector<128x256xf32>
    %cst_11 = arith.constant dense<0.000000e+00> : vector<8x256xf32>
    %12 = tpu.matmul %10, %11, %cst_11 {dimension_numbers = #tpu.dot_dimension_numbers<[1], [0], [0], [1], [0, 0, 1, 1], [], []>} : vector<8x128xf32>, vector<128x256xf32>, vector<8x256xf32> -> vector<8x256xf32>
    %13 = arith.addf %9, %12 : vector<8x256xf32>
    %14 = vector.extract_strided_slice %13 {offsets = [0, 0], sizes = [8, 128], strides = [1, 1]} : vector<8x256xf32> to vector<8x128xf32>
    %15 = vector.extract_strided_slice %13 {offsets = [0, 128], sizes = [8, 128], strides = [1, 1]} : vector<8x256xf32> to vector<8x128xf32>
    %cst_12 = arith.constant dense<0xFF800000> : vector<8xf32>
    %16 = vector.multi_reduction <maximumf>, %15, %cst_12 [1] : vector<8x128xf32> to vector<8xf32>
    %17 = vector.shape_cast %16 : vector<8xf32> to vector<8x1xf32>
    %18 = vector.broadcast %17 : vector<8x1xf32> to vector<8x128xf32>
    %19 = arith.subf %15, %18 : vector<8x128xf32>
    %20 = math.exp %19 : vector<8x128xf32>
    %cst_13 = arith.constant dense<0.000000e+00> : vector<8xf32>
    %21 = vector.multi_reduction <add>, %20, %cst_13 [1] : vector<8x128xf32> to vector<8xf32>
    %22 = vector.shape_cast %21 : vector<8xf32> to vector<8x1xf32>
    %23 = math.log %22 : vector<8x1xf32>
    %24 = vector.broadcast %23 : vector<8x1xf32> to vector<8x128xf32>
    %25 = arith.subf %19, %24 : vector<8x128xf32>
    %c0_14 = arith.constant 0 : index
    %c0_15 = arith.constant 0 : index
    %c0_16 = arith.constant 0 : index
    %26 = vector.load %arg6[%c0_14, %c0_15, %c0_16] : memref<1x8x128xf32, #tpu.memory_space<vmem>>, vector<1x8x128xf32>
    %27 = vector.shape_cast %26 : vector<1x8x128xf32> to vector<8x128xf32>
    %28 = vector.shape_cast %25 : vector<8x128xf32> to vector<1x8x128xf32>
    tpu.vector_store %arg6[%c0_14, %c0_15, %c0_16], %28 {strides = array<i32>} : memref<1x8x128xf32, #tpu.memory_space<vmem>>, vector<1x8x128xf32>,
    %c0_17 = arith.constant 0 : index
    %c0_18 = arith.constant 0 : index
    %29 = vector.load %arg7[%c0_17, %c0_18] : memref<8x128xf32, #tpu.memory_space<vmem>>, vector<8x128xf32>
    tpu.vector_store %arg7[%c0_17, %c0_18], %14 {strides = array<i32>} : memref<8x128xf32, #tpu.memory_space<vmem>>, vector<8x128xf32>,
    return
  }
  func.func @transform_0(%arg0: i32) -> (i32, i32, i32) {
    %c0_i32 = arith.constant 0 : i32
    %c0_i32_0 = arith.constant 0 : i32
    %c0_i32_1 = arith.constant 0 : i32
    return %arg0, %c0_i32, %c0_i32_0 : i32, i32, i32
  }
  func.func @transform_1(%arg0: i32) -> (i32, i32) {
    %c0_i32 = arith.constant 0 : i32
    %c0_i32_0 = arith.constant 0 : i32
    %c0_i32_1 = arith.constant 0 : i32
    return %c0_i32, %c0_i32_0 : i32, i32
  }
  func.func @transform_2(%arg0: i32) -> (i32, i32) {
    %c0_i32 = arith.constant 0 : i32
    %c0_i32_0 = arith.constant 0 : i32
    %c0_i32_1 = arith.constant 0 : i32
    return %c0_i32, %c0_i32_0 : i32, i32
  }
  func.func @transform_3(%arg0: i32) -> (i32, i32) {
    %c0_i32 = arith.constant 0 : i32
    %c0_i32_0 = arith.constant 0 : i32
    %c0_i32_1 = arith.constant 0 : i32
    return %c0_i32, %c0_i32_0 : i32, i32
  }
  func.func @transform_4(%arg0: i32) -> (i32, i32) {
    %c0_i32 = arith.constant 0 : i32
    %c0_i32_0 = arith.constant 0 : i32
    %c0_i32_1 = arith.constant 0 : i32
    return %c0_i32, %c0_i32_0 : i32, i32
  }
  func.func @transform_5(%arg0: i32) -> (i32, i32, i32) {
    %c0_i32 = arith.constant 0 : i32
    %c0_i32_0 = arith.constant 0 : i32
    %c0_i32_1 = arith.constant 0 : i32
    return %arg0, %c0_i32, %c0_i32_0 : i32, i32, i32
  }
  func.func @transform_6(%arg0: i32) -> (i32, i32) {
    %c0_i32 = arith.constant 0 : i32
    %c0_i32_0 = arith.constant 0 : i32
    %c0_i32_1 = arith.constant 0 : i32
    return %c0_i32, %c0_i32_0 : i32, i32
  }
}

</mosaic_0001>

<bundles_post_ra>
// kernel: rnn_forward.1
= control target key start
LH: loop header
LB: loop body
LE: loop exit
PB: predicated region body
PF: predicated region fallthrough
CT: control target
= control target key end

     0   :  { %12 = vsyncpa [#allocation3], 0  ;;  %s414_s0 = inlined_call_operand.vmem [shape: f32[1,8,128], index: 0, kind: input, shape index: {}]   ;;  %s415_s1 = inlined_call_operand.vmem [shape: f32[8,128], index: 1, kind: input, shape index: {}]   ;;  %s416_s2 = inlined_call_operand.hbm [shape: f32[128,256], index: 2, kind: input, shape index: {}]   ;;  %s417_s3 = inlined_call_operand.hbm [shape: f32[128,256], index: 3, kind: input, shape index: {}]   ;;  %s418_s4 = inlined_call_operand.vmem [shape: f32[1,256], index: 4, kind: input, shape index: {}]   ;;  %s419_s5 = inlined_call_operand.vmem [shape: f32[1,8,128], index: 5, kind: output, shape index: {0}]   ;;  %s420_s6 = inlined_call_operand.vmem [shape: f32[8,128], index: 6, kind: output, shape index: {1}]  }
   0x1   :  { %13 = vsyncpa [#allocation5], 0  ;;  %s353_s21 = smov [#allocation2]  }
   0x2   :  { %s23_s22 = sshll.u32 %s353_s21, 4  ;;  %s24_s22 = int_to_ptr.vmem [resolvable:$true] %s23_s22 }
   0x3   :  { %s317_s23 = scalar_lea.vmem %s24_s22, 4096  ;;  %p322_p1 = scmp.lt.s32.totalorder %s24_s22, %s24_s22 }
   0x4   :  { %p318_p0 = scmp.ne.s32.totalorder %s24_s22, %s317_s23  ;;  %p323_p2 = scmp.lt.s32.totalorder %s317_s23, %s317_s23 }
   0x6   :  { %p324_p3 = por %p323_p2, %p322_p1 }
   0x8   :  { %p325_p4 = pnand %p324_p3, %p318_p0 }
   0xa   :  { %328 = shalt.err (!%p325_p4)
}
   0xb   :  { %s354_s24 = smov 256   ;;  %s355_s25 = smov 16  }
   0xc   :  { %29 = dma.hbm_to_vmem [thread:$0]  %s416_s2, 4096, %s24_s22, [#allocation3], %s354_s24, %s354_s24, %s355_s25  }
   0xd   :  { %s356_s28 = smov [#allocation4]  }
   0xe   :  { %s35_s29 = sshll.u32 %s356_s28, 4  ;;  %s36_s29 = int_to_ptr.vmem [resolvable:$true] %s35_s29 }
   0xf   :  { %s337_s30 = scalar_lea.vmem %s36_s29, 4096  ;;  %p342_p6 = scmp.lt.s32.totalorder %s36_s29, %s36_s29 }
  0x10   :  { %p338_p5 = scmp.ne.s32.totalorder %s36_s29, %s337_s30  ;;  %p343_p7 = scmp.lt.s32.totalorder %s337_s30, %s337_s30 }
  0x12   :  { %p344_p8 = por %p343_p7, %p342_p6 }
  0x14   :  { %p345_p9 = pnand %p344_p8, %p338_p5 }
  0x16   :  { %348 = shalt.err (!%p345_p9)
}
  0x17   :  { %41 = dma.hbm_to_vmem [thread:$0]  %s417_s3, 4096, %s36_s29, [#allocation5], %s354_s24, %s354_s24, %s355_s25  }
  0x18   :  { %349 = dma.done.wait [#allocation3], 4096  }
  0x19   :  { %350 = vsyncadd [#allocation3], 4294963200 }
  0x1a   :  { %351 = dma.done.wait [#allocation5], 4096  }
  0x1b   :  { %352 = vsyncadd [#allocation5], 4294963200  ;;  %v357_v0 = vmov 0.0   ;;  %v88_v1 = vld [vmem:[#allocation2 + $0xf8] sm:$0xff]  ;;  %v87_v3 = vld [vmem:[#allocation2 + $0xf0] sm:$0xff] }
  0x1c   :  { %165 = vmatprep.mubr.f32.mxu0 %v357_v0  ;;  %269 = vmatprep.mubr.f32.mxu1 %v357_v0  ;;  %v204_v2 = vld [vmem:[#allocation4 + $0xf8] sm:$0xff]  ;;  %v203_v4 = vld [vmem:[#allocation4 + $0xf0] sm:$0xff]  ;;  %v86_v5 = vld [vmem:[#allocation2 + $0xe8] sm:$0xff] }
  0x1d   :  { %101 = vmatprep.subr.mxu0 %v88_v1  ;;  %205 = vmatprep.subr.mxu1 %v204_v2  ;;  %v202_v6 = vld [vmem:[#allocation4 + $0xe8] sm:$0xff]  ;;  %v85_v7 = vld [vmem:[#allocation2 + $0xe0] sm:$0xff]  ;;  %v84_v9 = vld [vmem:[#allocation2 + $0xd8] sm:$0xff] }
  0x1e   :  { %102 = vmatpush1.msra.mxu0 %v87_v3  ;;  %206 = vmatpush1.msra.mxu1 %v203_v4  ;;  %v201_v8 = vld [vmem:[#allocation4 + $0xe0] sm:$0xff]  ;;  %v200_v10 = vld [vmem:[#allocation4 + $0xd8] sm:$0xff]  ;;  %v83_v11 = vld [vmem:[#allocation2 + $0xd0] sm:$0xff]  ;;  %v91_v3 = vlaneseq }
  0x1f   :  { %103 = vmatprep.subr.mxu0 %v86_v5  ;;  %207 = vmatprep.subr.mxu1 %v202_v6  ;;  %v199_v12 = vld [vmem:[#allocation4 + $0xd0] sm:$0xff]  ;;  %v82_v13 = vld [vmem:[#allocation2 + $0xc8] sm:$0xff]  ;;  %v81_v15 = vld [vmem:[#allocation2 + $0xc0] sm:$0xff] }
  0x20   :  { %104 = vmatpush1.msra.mxu0 %v85_v7  ;;  %208 = vmatpush1.msra.mxu1 %v201_v8  ;;  %v198_v14 = vld [vmem:[#allocation4 + $0xc8] sm:$0xff]  ;;  %v197_v16 = vld [vmem:[#allocation4 + $0xc0] sm:$0xff]  ;;  %v80_v17 = vld [vmem:[#allocation2 + $0xb8] sm:$0xff]  ;;  %v92_v4 = vshrl.u32 %v91_v3, 7 }
  0x21   :  { %105 = vmatprep.subr.mxu0 %v84_v9  ;;  %209 = vmatprep.subr.mxu1 %v200_v10  ;;  %v196_v18 = vld [vmem:[#allocation4 + $0xb8] sm:$0xff]  ;;  %v79_v19 = vld [vmem:[#allocation2 + $0xb0] sm:$0xff]  ;;  %v78_v21 = vld [vmem:[#allocation2 + $0xa8] sm:$0xff] }
  0x22   :  { %106 = vmatpush1.msra.mxu0 %v83_v11  ;;  %210 = vmatpush1.msra.mxu1 %v199_v12  ;;  %v195_v20 = vld [vmem:[#allocation4 + $0xb0] sm:$0xff]  ;;  %v194_v22 = vld [vmem:[#allocation4 + $0xa8] sm:$0xff]  ;;  %v77_v23 = vld [vmem:[#allocation2 + $0xa0] sm:$0xff]  ;;  %v93_v5 = vsub.s32 0, %v92_v4  ;;  %v97_v7 = vsub.s32 1, %v92_v4 }
  0x23   :  { %107 = vmatprep.subr.mxu0 %v82_v13  ;;  %211 = vmatprep.subr.mxu1 %v198_v14  ;;  %v193_v24 = vld [vmem:[#allocation4 + $0xa0] sm:$0xff]  ;;  %v76_v25 = vld [vmem:[#allocation2 + $0x98] sm:$0xff]  ;;  %v75_v27 = vld [vmem:[#allocation2 + $0x90] sm:$0xff] }
  0x24   :  { %108 = vmatpush1.msra.mxu0 %v81_v15  ;;  %212 = vmatpush1.msra.mxu1 %v197_v16  ;;  %v192_v26 = vld [vmem:[#allocation4 + $0x98] sm:$0xff]  ;;  %v191_v28 = vld [vmem:[#allocation4 + $0x90] sm:$0xff]  ;;  %v74_v29 = vld [vmem:[#allocation2 + $0x88] sm:$0xff] }
  0x25   :  { %109 = vmatprep.subr.mxu0 %v80_v17  ;;  %213 = vmatprep.subr.mxu1 %v196_v18  ;;  %v190_v30 = vld [vmem:[#allocation4 + $0x88] sm:$0xff]  ;;  %v73_v31 = vld [vmem:[#allocation2 + $0x80] sm:$0xff]  ;;  %v72_v33 = vld [vmem:[#allocation2 + $0x78] sm:$0xff] }
  0x26   :  { %110 = vmatpush1.msra.mxu0 %v79_v19  ;;  %214 = vmatpush1.msra.mxu1 %v195_v20  ;;  %v189_v32 = vld [vmem:[#allocation4 + $0x80] sm:$0xff]  ;;  %v188_v34 = vld [vmem:[#allocation4 + $0x78] sm:$0xff]  ;;  %v71_v35 = vld [vmem:[#allocation2 + $0x70] sm:$0xff] }
  0x27   :  { %111 = vmatprep.subr.mxu0 %v78_v21  ;;  %215 = vmatprep.subr.mxu1 %v194_v22  ;;  %v187_v36 = vld [vmem:[#allocation4 + $0x70] sm:$0xff]  ;;  %v70_v37 = vld [vmem:[#allocation2 + $0x68] sm:$0xff]  ;;  %v69_v39 = vld [vmem:[#allocation2 + $0x60] sm:$0xff] }
  0x28   :  { %112 = vmatpush1.msra.mxu0 %v77_v23  ;;  %216 = vmatpush1.msra.mxu1 %v193_v24  ;;  %v186_v38 = vld [vmem:[#allocation4 + $0x68] sm:$0xff]  ;;  %v185_v40 = vld [vmem:[#allocation4 + $0x60] sm:$0xff]  ;;  %v68_v41 = vld [vmem:[#allocation2 + $0x58] sm:$0xff] }
  0x29   :  { %113 = vmatprep.subr.mxu0 %v76_v25  ;;  %217 = vmatprep.subr.mxu1 %v192_v26  ;;  %v184_v42 = vld [vmem:[#allocation4 + $0x58] sm:$0xff]  ;;  %v67_v43 = vld [vmem:[#allocation2 + $0x50] sm:$0xff]  ;;  %v66_v45 = vld [vmem:[#allocation2 + $0x48] sm:$0xff] }
  0x2a   :  { %114 = vmatpush1.msra.mxu0 %v75_v27  ;;  %218 = vmatpush1.msra.mxu1 %v191_v28  ;;  %v183_v44 = vld [vmem:[#allocation4 + $0x50] sm:$0xff]  ;;  %v182_v46 = vld [vmem:[#allocation4 + $0x48] sm:$0xff]  ;;  %v65_v47 = vld [vmem:[#allocation2 + $0x40] sm:$0xff] }
  0x2b   :  { %115 = vmatprep.subr.mxu0 %v74_v29  ;;  %219 = vmatprep.subr.mxu1 %v190_v30  ;;  %v181_v48 = vld [vmem:[#allocation4 + $0x40] sm:$0xff]  ;;  %v64_v49 = vld [vmem:[#allocation2 + $0x38] sm:$0xff]  ;;  %v63_v51 = vld [vmem:[#allocation2 + $0x30] sm:$0xff] }
  0x2c   :  { %116 = vmatpush1.msra.mxu0 %v73_v31  ;;  %220 = vmatpush1.msra.mxu1 %v189_v32  ;;  %v180_v50 = vld [vmem:[#allocation4 + $0x38] sm:$0xff]  ;;  %v179_v52 = vld [vmem:[#allocation4 + $0x30] sm:$0xff]  ;;  %v62_v53 = vld [vmem:[#allocation2 + $0x28] sm:$0xff] }
  0x2d   :  { %117 = vmatprep.subr.mxu0 %v72_v33  ;;  %221 = vmatprep.subr.mxu1 %v188_v34  ;;  %v178_v54 = vld [vmem:[#allocation4 + $0x28] sm:$0xff]  ;;  %v61_v55 = vld [vmem:[#allocation2 + $0x20] sm:$0xff]  ;;  %v60_v57 = vld [vmem:[#allocation2 + $0x18] sm:$0xff] }
  0x2e   :  { %118 = vmatpush1.msra.mxu0 %v71_v35  ;;  %222 = vmatpush1.msra.mxu1 %v187_v36  ;;  %v177_v56 = vld [vmem:[#allocation4 + $0x20] sm:$0xff]  ;;  %v176_v58 = vld [vmem:[#allocation4 + $0x18] sm:$0xff]  ;;  %v59_v59 = vld [vmem:[#allocation2 + $0x10] sm:$0xff] }
  0x2f   :  { %119 = vmatprep.subr.mxu0 %v70_v37  ;;  %223 = vmatprep.subr.mxu1 %v186_v38  ;;  %v175_v60 = vld [vmem:[#allocation4 + $0x10] sm:$0xff]  ;;  %v58_v61 = vld [vmem:[#allocation2 + $0x8] sm:$0xff]  ;;  %v57_v63 = vld [vmem:[#allocation2] sm:$0xff] }
  0x30   :  { %120 = vmatpush1.msra.mxu0 %v69_v39  ;;  %224 = vmatpush1.msra.mxu1 %v185_v40  ;;  %v174_v62 = vld [vmem:[#allocation4 + $0x8] sm:$0xff]  ;;  %v173_v0 = vld [vmem:[#allocation4] sm:$0xff] }
  0x31   :  { %121 = vmatprep.subr.mxu0 %v68_v41  ;;  %225 = vmatprep.subr.mxu1 %v184_v42  ;;  %v56_v1 = vld [vmem:[%s414_s0] sm:$0xff] }
  0x32   :  { %122 = vmatpush1.msra.mxu0 %v67_v43  ;;  %226 = vmatpush1.msra.mxu1 %v183_v44  ;;  %v54_v2 = vld [vmem:[%s415_s1] sm:$0xff] }
  0x33   :  { %123 = vmatprep.subr.mxu0 %v66_v45  ;;  %227 = vmatprep.subr.mxu1 %v182_v46  ;;  %v89_v6 = vld [vmem:[%s418_s4] sm:$0x3] }
  0x34   :  { %124 = vmatpush1.msra.mxu0 %v65_v47  ;;  %228 = vmatpush1.msra.mxu1 %v181_v48  ;;  %v94_v8 = vrot.slane %v89_v6, %v93_v5  ;;  %v98_v9 = vrot.slane %v89_v6, %v97_v7 }
  0x35   :  { %125 = vmatprep.subr.mxu0 %v64_v49  ;;  %229 = vmatprep.subr.mxu1 %v180_v50 }
  0x36   :  { %126 = vmatpush1.msra.mxu0 %v63_v51  ;;  %230 = vmatpush1.msra.mxu1 %v179_v52 }
  0x37   :  { %127 = vmatprep.subr.mxu0 %v62_v53  ;;  %231 = vmatprep.subr.mxu1 %v178_v54 }
  0x38   :  { %128 = vmatpush1.msra.mxu0 %v61_v55  ;;  %232 = vmatpush1.msra.mxu1 %v177_v56 }
  0x39   :  { %129 = vmatprep.subr.mxu0 %v60_v57  ;;  %233 = vmatprep.subr.mxu1 %v176_v58 }
  0x3a   :  { %130 = vmatpush1.msra.mxu0 %v59_v59  ;;  %234 = vmatpush1.msra.mxu1 %v175_v60 }
  0x3b   :  { %131 = vmatprep.subr.mxu0 %v58_v61  ;;  %235 = vmatprep.subr.mxu1 %v174_v62 }
  0x3c   :  { %132 = vmatpush1.msra.mxu0 %v57_v63  ;;  %236 = vmatpush1.msra.mxu1 %v173_v0 }
  0x3d   :  { %166 = vmatmul.mubr.f32.vlgmr.msra.gmra.mxu0 %v56_v1  ;;  %270 = vmatmul.mubr.f32.vlgmr.msra.gmra.mxu1 %v54_v2 }
  0xfd   :  { %v167_v10 = vpop.f32.mrf.mxu0  ;;  %v271_v11 = vpop.f32.mrf.mxu1 }
  0xfe   :  { %v168_v12 = vadd.f32 %v167_v10, %v94_v8 }
  0xff   :  { %v169_v13 = vpop.f32.mrf.mxu0  ;;  %v273_v16 = vpop.f32.mrf.mxu1 }
 0x100   :  { %v276_v14 = vadd.f32 %v271_v11, %v168_v12  ;;  %v170_v15 = vadd.f32 %v169_v13, %v98_v9 }
 0x102   :  { %289 = vst [vmem:[%s420_s6] sm:$0xff] %v276_v14  ;;  %v277_v17 = vadd.f32 %v273_v16, %v170_v15 }
 0x104   :  { %278 = vmax.xlane.f32.xlu0 %v277_v17 }
 0x18d   :  { %v279_v18 = vpop.xlane.xlu0 %278 }
 0x18e   :  { %v280_v19 = vsub.f32 %v277_v17, %v279_v18 }
 0x190   :  { %v281_v20 = vmul.f32 1.442695, %v280_v19 }
 0x192   :  { %305 = vpow2.f32 %v281_v20 }
 0x19f   :  { %v306_v21 = vpop.eup %305 }
 0x1a0   :  { %283 = vadd.xlane.f32.xlu0 %v306_v21 }
 0x229   :  { %v284_v22 = vpop.xlane.xlu0 %283 }
 0x22a   :  { %307 = vlog2.f32 %v284_v22 }
 0x237   :  { %v308_v23 = vpop.eup %307 }
 0x238   :  { %v286_v24 = vmul.f32 0.6931472, %v308_v23 }
 0x23a   :  { %v287_v25 = vsub.f32 %v280_v19, %v286_v24 }
 0x23c   :  { %288 = vst [vmem:[%s419_s5] sm:$0xff] %v287_v25 }
 0x23d   :  { %298 = vsyncpa [#allocation3], 1 }
 0x23e   :  { %299 = vsyncpa [#allocation5], 1 }

</bundles_post_ra>
